<compile_context>
chip_gen: v6e
topology: v6e:2x2x1
jax: 0.10.0
libtpu: 0.0.40
codegen_flags: <defaults>
</compile_context>

<pallas_src>
import jax
import jax.numpy as jnp
from jax.experimental import pallas as pl
from jax.experimental.pallas import tpu as pltpu


def _pick_tile(n, max_tile):
    """Largest tile <= max_tile that divides n (multiple of 8 if n is tiled)."""
    if n <= max_tile:
        return n
    t = (max_tile // 8) * 8
    while t >= 8:
        if n % t == 0:
            return t
        t -= 8
    return n  # no clean divisor -> single tile (avoids padded-K garbage)


def _mlp_attention_kernel(vl_ref,                       # scalar prefetch: (B,) int32 in SMEM
                          q_ref, k_ref, val_ref,        # (Qt,Dq) (Kt,Dk) (Kt,Dv)
                          wq_ref, wk_ref, v_ref,        # (Dq,U) (Dk,U) (1,U)
                          o_ref,                        # (Qt,Dv)
                          m_sc, l_sc, acc_sc, qh_sc):   # VMEM scratch
    b = pl.program_id(0)
    ki = pl.program_id(2)
    num_k = pl.num_programs(2)
    Kt = k_ref.shape[0]

    vl = vl_ref[b]
    k_start = ki * Kt

    # ---- init per (batch, Q-tile): running stats + query projection --------
    @pl.when(ki == 0)
    def _init():
        m_sc[...] = jnp.full_like(m_sc, -jnp.inf)
        l_sc[...] = jnp.zeros_like(l_sc)
        acc_sc[...] = jnp.zeros_like(acc_sc)
        # bf16 MXU operands, f32 accumulation; computed once, reused for all K tiles.
        qh_sc[...] = jnp.dot(q_ref[...].astype(jnp.bfloat16),
                             wq_ref[...].astype(jnp.bfloat16),
                             preferred_element_type=jnp.float32)

    # Skip K tiles that are entirely masked out.  vl == 0 must still be
    # processed so the fully-masked softmax degenerates to uniform weights,
    # matching the reference masked_softmax semantics.
    process = jnp.logical_or(vl == 0, k_start < vl)

    @pl.when(process)
    def _tile():
        kh = jnp.dot(k_ref[...].astype(jnp.bfloat16),
                     wk_ref[...].astype(jnp.bfloat16),
                     preferred_element_type=jnp.float32)              # (Kt, U)

        # Additive tanh features for this K tile only (never full (Q,K,U)).
        # TODO(synk): on v6e/v7x this elementwise path could run in bf16 for ~2x
        # EUP/VPU throughput; kept f32 so the same kernel stays correct/fast on v5e.
        feats = jnp.tanh(qh_sc[...][:, None, :] + kh[None, :, :])     # (Qt, Kt, U)

        # Rank-1 contraction on VPU + XLU (lane-major (1,U) broadcast), avoiding
        # a degenerate (Q*K,U)x(U,1) MXU matmul and the non-view reshape.
        scores = jnp.sum(feats * v_ref[...], axis=-1)                 # (Qt, Kt)

        kidx = k_start + jax.lax.broadcasted_iota(jnp.int32, scores.shape, 1)
        masked = jnp.where(kidx < vl, scores, jnp.float32(-1000000.0))

        # Online (flash-style) masked softmax update.
        m_prev = m_sc[...]
        m_new = jnp.maximum(m_prev, jnp.max(masked, axis=-1, keepdims=True))
        alpha = jnp.exp(m_prev - m_new)
        p = jnp.exp(masked - m_new)                                   # (Qt, Kt)

        l_sc[...] = alpha * l_sc[...] + jnp.sum(p, axis=-1, keepdims=True)
        acc_sc[...] = alpha * acc_sc[...] + jnp.dot(
            p.astype(jnp.bfloat16), val_ref[...].astype(jnp.bfloat16),
            preferred_element_type=jnp.float32)
        m_sc[...] = m_new

    # ---- finalize: fold 1/l into the output (approx reciprocal on EUP) -----
    @pl.when(ki == num_k - 1)
    def _finalize():
        # TODO(synk): dropout is identity in eval mode; not applied here.
        o_ref[...] = (acc_sc[...] *
                      pl.reciprocal(l_sc[...], approx=True)).astype(o_ref.dtype)


def mlp_attention(query, key, value, valid_len, wq, wk, v,
                  q_tile=256, k_tile=256):
    B, Q, Dq = query.shape
    _, K, Dk = key.shape
    Dv = value.shape[-1]
    U = wq.shape[1]

    Qt = _pick_tile(Q, q_tile)
    Kt = _pick_tile(K, k_tile)

    v_row = v.reshape(1, U)                 # lane-major layout for the broadcast-mul reduce
    valid_len = valid_len.astype(jnp.int32)

    grid = (B, Q // Qt, K // Kt)

    grid_spec = pltpu.PrefetchScalarGridSpec(
        num_scalar_prefetch=1,
        grid=grid,
        in_specs=[
            pl.BlockSpec((None, Qt, Dq), lambda b, qi, ki, vl: (b, qi, 0)),
            pl.BlockSpec((None, Kt, Dk), lambda b, qi, ki, vl: (b, ki, 0)),
            pl.BlockSpec((None, Kt, Dv), lambda b, qi, ki, vl: (b, ki, 0)),
            pl.BlockSpec((Dq, U), lambda b, qi, ki, vl: (0, 0)),   # VMEM-resident weights
            pl.BlockSpec((Dk, U), lambda b, qi, ki, vl: (0, 0)),
            pl.BlockSpec((1, U), lambda b, qi, ki, vl: (0, 0)),
        ],
        out_specs=pl.BlockSpec((None, Qt, Dv), lambda b, qi, ki, vl: (b, qi, 0)),
        scratch_shapes=[
            pltpu.VMEM((Qt, 1), jnp.float32),    # running max
            pltpu.VMEM((Qt, 1), jnp.float32),    # running denominator
            pltpu.VMEM((Qt, Dv), jnp.float32),   # running attn @ value
            pltpu.VMEM((Qt, U), jnp.float32),    # query projection (per Q tile)
        ],
    )

    return pl.pallas_call(
        _mlp_attention_kernel,
        out_shape=jax.ShapeDtypeStruct((B, Q, Dv), query.dtype),
        grid_spec=grid_spec,
        compiler_params=pltpu.CompilerParams(
            dimension_semantics=("parallel", "parallel", "arbitrary")),
    )(valid_len, query, key, value, wq, wk, v_row)


def mlp_attention_ref(query, key, value, valid_len, wq, wk, v):
    """Pure-JAX f32 reference mirroring the PyTorch forward (eval mode)."""
    qh = query @ wq                                            # (B, Q, U)
    kh = key @ wk                                              # (B, K, U)
    feats = jnp.tanh(qh[:, :, None, :] + kh[:, None, :, :])    # (B, Q, K, U)
    scores = jnp.squeeze(feats @ v, -1)                        # (B, Q, K)
    kidx = jnp.arange(scores.shape[-1])
    mask = kidx[None, None, :] < valid_len[:, None, None]
    masked = jnp.where(mask, scores, -1000000.0)
    attn = jax.nn.softmax(masked, axis=-1)
    return attn @ value


if __name__ == "__main__":
    B, Q, K = 2, 8, 16
    Dq, Dk, Dv, U = 16, 16, 16, 32

    root = jax.random.PRNGKey(0)
    kq, kk, kv, kwq, kwk, kvv = jax.random.split(root, 6)

    query = jax.random.normal(kq, (B, Q, Dq), dtype=jnp.float32)
    key = jax.random.normal(kk, (B, K, Dk), dtype=jnp.float32)
    value = jax.random.normal(kv, (B, K, Dv), dtype=jnp.float32)

    # Deterministic parameter init (shapes per nn.Linear defs, bias=False).
    wq = jax.random.normal(kwq, (Dq, U), dtype=jnp.float32) * 0.1
    wk = jax.random.normal(kwk, (Dk, U), dtype=jnp.float32) * 0.1
    vv = jax.random.normal(kvv, (U, 1), dtype=jnp.float32) * 0.1

    # k_tile=8 -> 2 K tiles: exercises the online softmax and valid_len tile-skip.
    valid_len = jnp.array([3, 12], dtype=jnp.int32)
    out = jax.block_until_ready(
        mlp_attention(query, key, value, valid_len, wq, wk, vv, k_tile=8))
    ref = mlp_attention_ref(query, key, value, valid_len, wq, wk, vv)
    assert out.shape == (B, Q, Dv)
    # bf16 MXU operands (per perf review) dominate the error vs the f32 reference.
    assert jnp.allclose(out, ref, atol=3e-2, rtol=3e-2), \
        float(jnp.max(jnp.abs(out - ref)))

    # Edge case: valid_len == 0 -> reference yields uniform attention weights.
    valid_len0 = jnp.array([0, K], dtype=jnp.int32)
    out0 = jax.block_until_ready(
        mlp_attention(query, key, value, valid_len0, wq, wk, vv, k_tile=8))
    ref0 = mlp_attention_ref(query, key, value, valid_len0, wq, wk, vv)
    assert jnp.allclose(out0, ref0, atol=3e-2, rtol=3e-2), \
        float(jnp.max(jnp.abs(out0 - ref0)))

    print("KERNEL_OK")
</pallas_src>

<mosaic_0001>
module attributes {stable_mosaic.version = 11 : i64} {
  func.func @_mlp_attention_kernel(%arg0: i32, %arg1: i32, %arg2: i32, %arg3: memref<2xi32, #tpu.memory_space<smem>>, %arg4: memref<1x8x16xf32, #tpu.memory_space<vmem>>, %arg5: memref<1x8x16xf32, #tpu.memory_space<vmem>>, %arg6: memref<1x8x16xf32, #tpu.memory_space<vmem>>, %arg7: memref<16x32xf32, #tpu.memory_space<vmem>>, %arg8: memref<16x32xf32, #tpu.memory_space<vmem>>, %arg9: memref<1x32xf32, #tpu.memory_space<vmem>>, %arg10: memref<1x8x16xf32, #tpu.memory_space<vmem>>, %arg11: memref<8x1xf32, #tpu.memory_space<vmem>>, %arg12: memref<8x1xf32, #tpu.memory_space<vmem>>, %arg13: memref<8x16xf32, #tpu.memory_space<vmem>>, %arg14: memref<8x32xf32, #tpu.memory_space<vmem>>) attributes {dimension_semantics = [#tpu.dimension_semantics<parallel>, #tpu.dimension_semantics<parallel>, #tpu.dimension_semantics<arbitrary>], iteration_bounds = array<i64: 2, 1, 2>, scalar_prefetch = 1 : i64, scratch_operands = 4 : i64, tpu.core_type = #tpu.core_type<tc>, window_params = [{transform_indices = @transform_0, window_bounds = array<i64: 1, 8, 16>}, {transform_indices = @transform_1, window_bounds = array<i64: 1, 8, 16>}, {transform_indices = @transform_2, window_bounds = array<i64: 1, 8, 16>}, {pipeline_mode = #tpu.pipeline_mode<synchronous>, transform_indices = @transform_3, window_bounds = array<i64: 16, 32>}, {pipeline_mode = #tpu.pipeline_mode<synchronous>, transform_indices = @transform_4, window_bounds = array<i64: 16, 32>}, {pipeline_mode = #tpu.pipeline_mode<synchronous>, transform_indices = @transform_5, window_bounds = array<i64: 1, 32>}, {transform_indices = @transform_6, window_bounds = array<i64: 1, 8, 16>}]} {
    %0 = arith.index_cast %arg0 : i32 to index
    %1 = memref.load %arg3[%0] : memref<2xi32, #tpu.memory_space<smem>>
    %c8_i32 = arith.constant 8 : i32
    %2 = arith.muli %arg2, %c8_i32 : i32
    %c0_i32 = arith.constant 0 : i32
    %3 = arith.cmpi eq, %arg2, %c0_i32 : i32
    %4 = arith.extui %3 : i1 to i32
    %c0_i32_0 = arith.constant 0 : i32
    %5 = arith.cmpi ne, %4, %c0_i32_0 : i32
    scf.if %5 {
      %cst = arith.constant 0xFF800000 : f32
      %14 = vector.broadcast %cst : f32 to vector<8x1xf32>
      %c0 = arith.constant 0 : index
      %c0_4 = arith.constant 0 : index
      %15 = vector.load %arg11[%c0, %c0_4] : memref<8x1xf32, #tpu.memory_space<vmem>>, vector<8x1xf32>
      tpu.vector_store %arg11[%c0, %c0_4], %14 {strides = array<i32>} : memref<8x1xf32, #tpu.memory_space<vmem>>, vector<8x1xf32>,
      %cst_5 = arith.constant 0.000000e+00 : f32
      %16 = vector.broadcast %cst_5 : f32 to vector<8x1xf32>
      %c0_6 = arith.constant 0 : index
      %c0_7 = arith.constant 0 : index
      %17 = vector.load %arg12[%c0_6, %c0_7] : memref<8x1xf32, #tpu.memory_space<vmem>>, vector<8x1xf32>
      tpu.vector_store %arg12[%c0_6, %c0_7], %16 {strides = array<i32>} : memref<8x1xf32, #tpu.memory_space<vmem>>, vector<8x1xf32>,
      %cst_8 = arith.constant 0.000000e+00 : f32
      %18 = vector.broadcast %cst_8 : f32 to vector<8x16xf32>
      %c0_9 = arith.constant 0 : index
      %c0_10 = arith.constant 0 : index
      %19 = vector.load %arg13[%c0_9, %c0_10] : memref<8x16xf32, #tpu.memory_space<vmem>>, vector<8x16xf32>
      tpu.vector_store %arg13[%c0_9, %c0_10], %18 {strides = array<i32>} : memref<8x16xf32, #tpu.memory_space<vmem>>, vector<8x16xf32>,
      %c0_11 = arith.constant 0 : index
      %c0_12 = arith.constant 0 : index
      %c0_13 = arith.constant 0 : index
      %20 = vector.load %arg4[%c0_11, %c0_12, %c0_13] : memref<1x8x16xf32, #tpu.memory_space<vmem>>, vector<1x8x16xf32>
      %21 = vector.shape_cast %20 : vector<1x8x16xf32> to vector<8x16xf32>
      %22 = arith.truncf %21 : vector<8x16xf32> to vector<8x16xbf16>
      %c0_14 = arith.constant 0 : index
      %c0_15 = arith.constant 0 : index
      %23 = vector.load %arg7[%c0_14, %c0_15] : memref<16x32xf32, #tpu.memory_space<vmem>>, vector<16x32xf32>
      %24 = arith.truncf %23 : vector<16x32xf32> to vector<16x32xbf16>
      %cst_16 = arith.constant dense<0.000000e+00> : vector<8x32xf32>
      %25 = tpu.matmul %22, %24, %cst_16 {dimension_numbers = #tpu.dot_dimension_numbers<[1], [0], [0], [1], [0, 0, 1, 1], [], []>} : vector<8x16xbf16>, vector<16x32xbf16>, vector<8x32xf32> -> vector<8x32xf32>
      %c0_17 = arith.constant 0 : index
      %c0_18 = arith.constant 0 : index
      %26 = vector.load %arg14[%c0_17, %c0_18] : memref<8x32xf32, #tpu.memory_space<vmem>>, vector<8x32xf32>
      tpu.vector_store %arg14[%c0_17, %c0_18], %25 {strides = array<i32>} : memref<8x32xf32, #tpu.memory_space<vmem>>, vector<8x32xf32>,
    } else {
    }
    %c0_i32_1 = arith.constant 0 : i32
    %6 = arith.cmpi eq, %1, %c0_i32_1 : i32
    %7 = arith.cmpi slt, %2, %1 : i32
    %8 = arith.ori %6, %7 : i1
    %9 = arith.extui %8 : i1 to i32
    %c0_i32_2 = arith.constant 0 : i32
    %10 = arith.cmpi ne, %9, %c0_i32_2 : i32
    scf.if %10 {
      %c0 = arith.constant 0 : index
      %c0_4 = arith.constant 0 : index
      %c0_5 = arith.constant 0 : index
      %14 = vector.load %arg5[%c0, %c0_4, %c0_5] : memref<1x8x16xf32, #tpu.memory_space<vmem>>, vector<1x8x16xf32>
      %15 = vector.shape_cast %14 : vector<1x8x16xf32> to vector<8x16xf32>
      %16 = arith.truncf %15 : vector<8x16xf32> to vector<8x16xbf16>
      %c0_6 = arith.constant 0 : index
      %c0_7 = arith.constant 0 : index
      %17 = vector.load %arg8[%c0_6, %c0_7] : memref<16x32xf32, #tpu.memory_space<vmem>>, vector<16x32xf32>
      %18 = arith.truncf %17 : vector<16x32xf32> to vector<16x32xbf16>
      %cst = arith.constant dense<0.000000e+00> : vector<8x32xf32>
      %19 = tpu.matmul %16, %18, %cst {dimension_numbers = #tpu.dot_dimension_numbers<[1], [0], [0], [1], [0, 0, 1, 1], [], []>} : vector<8x16xbf16>, vector<16x32xbf16>, vector<8x32xf32> -> vector<8x32xf32>
      %c0_8 = arith.constant 0 : index
      %c0_9 = arith.constant 0 : index
      %20 = vector.load %arg14[%c0_8, %c0_9] : memref<8x32xf32, #tpu.memory_space<vmem>>, vector<8x32xf32>
      %21 = vector.shape_cast %20 : vector<8x32xf32> to vector<8x1x32xf32>
      %22 = vector.shape_cast %19 : vector<8x32xf32> to vector<1x8x32xf32>
      %23 = vector.broadcast %21 : vector<8x1x32xf32> to vector<8x8x32xf32>
      %24 = vector.broadcast %22 : vector<1x8x32xf32> to vector<8x8x32xf32>
      %25 = arith.addf %23, %24 : vector<8x8x32xf32>
      %26 = math.tanh %25 : vector<8x8x32xf32>
      %c0_10 = arith.constant 0 : index
      %c0_11 = arith.constant 0 : index
      %27 = vector.load %arg9[%c0_10, %c0_11] : memref<1x32xf32, #tpu.memory_space<vmem>>, vector<1x32xf32>
      %28 = vector.shape_cast %27 : vector<1x32xf32> to vector<1x1x32xf32>
      %29 = vector.broadcast %28 : vector<1x1x32xf32> to vector<8x8x32xf32>
      %30 = arith.mulf %26, %29 : vector<8x8x32xf32>
      %cst_12 = arith.constant dense<0.000000e+00> : vector<8x8xf32>
      %31 = vector.multi_reduction <add>, %30, %cst_12 [2] : vector<8x8x32xf32> to vector<8x8xf32>
      %32 = tpu.iota {dimensions = array<i32: 1>} : vector<8x8xi32>
      %33 = vector.broadcast %2 : i32 to vector<8x8xi32>
      %34 = arith.addi %33, %32 : vector<8x8xi32>
      %35 = vector.broadcast %1 : i32 to vector<8x8xi32>
      %36 = arith.cmpi slt, %34, %35 : vector<8x8xi32>
      %cst_13 = arith.constant -1.000000e+06 : f32
      %37 = vector.broadcast %cst_13 : f32 to vector<8x8xf32>
      %38 = arith.select %36, %31, %37 : vector<8x8xi1>, vector<8x8xf32>
      %c0_14 = arith.constant 0 : index
      %c0_15 = arith.constant 0 : index
      %39 = vector.load %arg11[%c0_14, %c0_15] : memref<8x1xf32, #tpu.memory_space<vmem>>, vector<8x1xf32>
      %cst_16 = arith.constant dense<0xFF800000> : vector<8xf32>
      %40 = vector.multi_reduction <maximumf>, %38, %cst_16 [1] : vector<8x8xf32> to vector<8xf32>
      %41 = vector.shape_cast %40 : vector<8xf32> to vector<8x1xf32>
      %42 = arith.maximumf %39, %41 : vector<8x1xf32>
      %43 = arith.subf %39, %42 : vector<8x1xf32>
      %44 = math.exp %43 : vector<8x1xf32>
      %45 = vector.broadcast %42 : vector<8x1xf32> to vector<8x8xf32>
      %46 = arith.subf %38, %45 : vector<8x8xf32>
      %47 = math.exp %46 : vector<8x8xf32>
      %c0_17 = arith.constant 0 : index
      %c0_18 = arith.constant 0 : index
      %48 = vector.load %arg12[%c0_17, %c0_18] : memref<8x1xf32, #tpu.memory_space<vmem>>, vector<8x1xf32>
      %49 = arith.mulf %44, %48 : vector<8x1xf32>
      %cst_19 = arith.constant dense<0.000000e+00> : vector<8xf32>
      %50 = vector.multi_reduction <add>, %47, %cst_19 [1] : vector<8x8xf32> to vector<8xf32>
      %51 = vector.shape_cast %50 : vector<8xf32> to vector<8x1xf32>
      %52 = arith.addf %49, %51 : vector<8x1xf32>
      %c0_20 = arith.constant 0 : index
      %c0_21 = arith.constant 0 : index
      %53 = vector.load %arg12[%c0_20, %c0_21] : memref<8x1xf32, #tpu.memory_space<vmem>>, vector<8x1xf32>
      tpu.vector_store %arg12[%c0_20, %c0_21], %52 {strides = array<i32>} : memref<8x1xf32, #tpu.memory_space<vmem>>, vector<8x1xf32>,
      %c0_22 = arith.constant 0 : index
      %c0_23 = arith.constant 0 : index
      %54 = vector.load %arg13[%c0_22, %c0_23] : memref<8x16xf32, #tpu.memory_space<vmem>>, vector<8x16xf32>
      %55 = vector.broadcast %44 : vector<8x1xf32> to vector<8x16xf32>
      %56 = arith.mulf %55, %54 : vector<8x16xf32>
      %57 = arith.truncf %47 : vector<8x8xf32> to vector<8x8xbf16>
      %c0_24 = arith.constant 0 : index
      %c0_25 = arith.constant 0 : index
      %c0_26 = arith.constant 0 : index
      %58 = vector.load %arg6[%c0_24, %c0_25, %c0_26] : memref<1x8x16xf32, #tpu.memory_space<vmem>>, vector<1x8x16xf32>
      %59 = vector.shape_cast %58 : vector<1x8x16xf32> to vector<8x16xf32>
      %60 = arith.truncf %59 : vector<8x16xf32> to vector<8x16xbf16>
      %cst_27 = arith.constant dense<0.000000e+00> : vector<8x16xf32>
      %61 = tpu.matmul %57, %60, %cst_27 {dimension_numbers = #tpu.dot_dimension_numbers<[1], [0], [0], [1], [0, 0, 1, 1], [], []>} : vector<8x8xbf16>, vector<8x16xbf16>, vector<8x16xf32> -> vector<8x16xf32>
      %62 = arith.addf %56, %61 : vector<8x16xf32>
      %c0_28 = arith.constant 0 : index
      %c0_29 = arith.constant 0 : index
      %63 = vector.load %arg13[%c0_28, %c0_29] : memref<8x16xf32, #tpu.memory_space<vmem>>, vector<8x16xf32>
      tpu.vector_store %arg13[%c0_28, %c0_29], %62 {strides = array<i32>} : memref<8x16xf32, #tpu.memory_space<vmem>>, vector<8x16xf32>,
      %c0_30 = arith.constant 0 : index
      %c0_31 = arith.constant 0 : index
      %64 = vector.load %arg11[%c0_30, %c0_31] : memref<8x1xf32, #tpu.memory_space<vmem>>, vector<8x1xf32>
      tpu.vector_store %arg11[%c0_30, %c0_31], %42 {strides = array<i32>} : memref<8x1xf32, #tpu.memory_space<vmem>>, vector<8x1xf32>,
    } else {
    }
    %c1_i32 = arith.constant 1 : i32
    %11 = arith.cmpi eq, %arg2, %c1_i32 : i32
    %12 = arith.extui %11 : i1 to i32
    %c0_i32_3 = arith.constant 0 : i32
    %13 = arith.cmpi ne, %12, %c0_i32_3 : i32
    scf.if %13 {
      %c0 = arith.constant 0 : index
      %c0_4 = arith.constant 0 : index
      %14 = vector.load %arg13[%c0, %c0_4] : memref<8x16xf32, #tpu.memory_space<vmem>>, vector<8x16xf32>
      %c0_5 = arith.constant 0 : index
      %c0_6 = arith.constant 0 : index
      %15 = vector.load %arg12[%c0_5, %c0_6] : memref<8x1xf32, #tpu.memory_space<vmem>>, vector<8x1xf32>
      %16 = tpu.reciprocal %15 {approx = true} : vector<8x1xf32> -> vector<8x1xf32>
      %17 = vector.broadcast %16 : vector<8x1xf32> to vector<8x16xf32>
      %18 = arith.mulf %14, %17 : vector<8x16xf32>
      %c0_7 = arith.constant 0 : index
      %c0_8 = arith.constant 0 : index
      %c0_9 = arith.constant 0 : index
      %19 = vector.load %arg10[%c0_7, %c0_8, %c0_9] : memref<1x8x16xf32, #tpu.memory_space<vmem>>, vector<1x8x16xf32>
      %20 = vector.shape_cast %19 : vector<1x8x16xf32> to vector<8x16xf32>
      %21 = vector.shape_cast %18 : vector<8x16xf32> to vector<1x8x16xf32>
      tpu.vector_store %arg10[%c0_7, %c0_8, %c0_9], %21 {strides = array<i32>} : memref<1x8x16xf32, #tpu.memory_space<vmem>>, vector<1x8x16xf32>,
    } else {
    }
    return
  }
  func.func @transform_0(%arg0: i32, %arg1: i32, %arg2: i32, %arg3: memref<2xi32, #tpu.memory_space<smem>>) -> (i32, i32, i32) {
    %c0_i32 = arith.constant 0 : i32
    %c0_i32_0 = arith.constant 0 : i32
    return %arg0, %arg1, %c0_i32 : i32, i32, i32
  }
  func.func @transform_1(%arg0: i32, %arg1: i32, %arg2: i32, %arg3: memref<2xi32, #tpu.memory_space<smem>>) -> (i32, i32, i32) {
    %c0_i32 = arith.constant 0 : i32
    %c0_i32_0 = arith.constant 0 : i32
    return %arg0, %arg2, %c0_i32 : i32, i32, i32
  }
  func.func @transform_2(%arg0: i32, %arg1: i32, %arg2: i32, %arg3: memref<2xi32, #tpu.memory_space<smem>>) -> (i32, i32, i32) {
    %c0_i32 = arith.constant 0 : i32
    %c0_i32_0 = arith.constant 0 : i32
    return %arg0, %arg2, %c0_i32 : i32, i32, i32
  }
  func.func @transform_3(%arg0: i32, %arg1: i32, %arg2: i32, %arg3: memref<2xi32, #tpu.memory_space<smem>>) -> (i32, i32) {
    %c0_i32 = arith.constant 0 : i32
    %c0_i32_0 = arith.constant 0 : i32
    %c0_i32_1 = arith.constant 0 : i32
    return %c0_i32, %c0_i32_0 : i32, i32
  }
  func.func @transform_4(%arg0: i32, %arg1: i32, %arg2: i32, %arg3: memref<2xi32, #tpu.memory_space<smem>>) -> (i32, i32) {
    %c0_i32 = arith.constant 0 : i32
    %c0_i32_0 = arith.constant 0 : i32
    %c0_i32_1 = arith.constant 0 : i32
    return %c0_i32, %c0_i32_0 : i32, i32
  }
  func.func @transform_5(%arg0: i32, %arg1: i32, %arg2: i32, %arg3: memref<2xi32, #tpu.memory_space<smem>>) -> (i32, i32) {
    %c0_i32 = arith.constant 0 : i32
    %c0_i32_0 = arith.constant 0 : i32
    %c0_i32_1 = arith.constant 0 : i32
    return %c0_i32, %c0_i32_0 : i32, i32
  }
  func.func @transform_6(%arg0: i32, %arg1: i32, %arg2: i32, %arg3: memref<2xi32, #tpu.memory_space<smem>>) -> (i32, i32, i32) {
    %c0_i32 = arith.constant 0 : i32
    %c0_i32_0 = arith.constant 0 : i32
    return %arg0, %arg1, %c0_i32 : i32, i32, i32
  }
}

</mosaic_0001>

<bundles_post_ra>
// kernel: tpu_custom_call.1
= control target key start
LH: loop header
LB: loop body
LE: loop exit
PB: predicated region body
PF: predicated region fallthrough
CT: control target
= control target key end

     0   :  { %s1499_s24 = smov [#allocation7]   ;;  %s1928_s0 = inlined_call_operand.hbm [shape: s32[2], index: 0, kind: input, shape index: {}]   ;;  %s1929_s1 = inlined_call_operand.hbm [shape: f32[2,8,16], index: 1, kind: input, shape index: {}]   ;;  %s1930_s2 = inlined_call_operand.hbm [shape: f32[2,16,16], index: 2, kind: input, shape index: {}]   ;;  %s1931_s3 = inlined_call_operand.hbm [shape: f32[2,16,16], index: 3, kind: input, shape index: {}]   ;;  %s1932_s4 = inlined_call_operand.hbm [shape: f32[16,32], index: 4, kind: input, shape index: {}]   ;;  %s1933_s5 = inlined_call_operand.hbm [shape: f32[16,32], index: 5, kind: input, shape index: {}]   ;;  %s1934_s6 = inlined_call_operand.vmem [shape: f32[1,32], index: 6, kind: input, shape index: {}]   ;;  %s1935_s7 = inlined_call_operand.hbm [shape: f32[2,8,16], index: 7, kind: output, shape index: {}]  }
   0x1   :  { %1955 = sst [smem:[#allocation34_spill]] %s1930_s2 }
   0x2   :  { %1956 = sst [smem:[#allocation35_spill]] %s1932_s4 }
   0x3   :  { %1957 = sst [smem:[#allocation36_spill]] %s1933_s5 }
   0x4   :  { %1958 = sst [smem:[#allocation37_spill]] %s1934_s6 }
   0x5   :  { %1959 = sst [smem:[#allocation38_spill]] %s1935_s7 }
   0x6   :  { %13 = dma.hbm_to_smem %s1928_s0, 16, %s1499_s24, [#allocation6] }
   0x7   :  { %1437 = dma.done.wait [#allocation6], 16 }
   0x8   :  { %1438 = vsyncadd [#allocation6], 4294967280 }
   0x9   :  { %15 = sfence }
   0xa   :  { %16 = vsyncpa [#allocation9], 0 }
   0xb   :  { %18 = vsyncpa [#allocation9 + $0x1], 0 }
   0xc   :  { %19 = vsyncpa [#allocation12], 0 }
   0xd   :  { %21 = vsyncpa [#allocation12 + $0x1], 0 }
   0xe   :  { %22 = vsyncpa [#allocation15], 0 }
   0xf   :  { %23 = vsyncpa [#allocation10], 0 }
  0x10   :  { %25 = vsyncpa [#allocation10 + $0x1], 0  ;;  %s1559_s27 = smov 0   ;;  %s1561_s28 = smov 0  }
  0x11   :  { %s1563_s29 = smov 0   ;;  %s1565_s30 = smov 0  }
  0x12   :  { %s1567_s8 = smov 0   ;;  %s1569_s0 = smov 0  }
  0x13   :  { %s1571_s9 = smov 0   ;;  %s1573_s10 = smov 0  }
  0x14   :  { %s1575_s11 = smov 0   ;;  %s1577_s12 = smov 0  }
  0x15   :  { %s1579_s13 = smov 0  }
  0x16 LB: > { %1960 = sst [smem:[#allocation23_spill]] %s1465_s29  ;;  %s1615_s14 = sadd.s32 4294967295, %s1497_s13   ;;  %s1497_s13 = sphi %s1579_s13, %s31_s13   ;;  %s1493_s12 = sphi %s1577_s12, %s2019_s12   ;;  %s1489_s11 = sphi %s1575_s11, %s2018_s11   ;;  %s1485_s10 = sphi %s1573_s10, %s2011_s10   ;;  %s1481_s9 = sphi %s1571_s9, %s2010_s9   ;;  %s1477_s0 = sphi %s1569_s0, %s2009_s0   ;;  %s1473_s8 = sphi %s1567_s8, %s2017_s8   ;;  %s1469_s30 = sphi %s1565_s30, %s2016_s30   ;;  %s1465_s29 = sphi %s1563_s29, %s2007_s29   ;;  %s1461_s28 = sphi %s1561_s28, %s2015_s28   ;;  %s1457_s27 = sphi %s1559_s27, %s2014_s27  }
  0x17   : > { %1961 = sst [smem:[#allocation24_spill]] %s1477_s0  ;;  %p999_p0 = scmp.ge.s32.totalorder %s1497_s13, 1 }
  0x18   : > { %1962 = sst [smem:[#allocation25_spill]] %s1481_s9  ;;  %p1945_p1 = scmp.eq.s32.totalorder %s1615_s14, 0 }
  0x19   : > { %1963 = sst [smem:[#allocation26_spill]] %s1485_s10  ;;  %p230_p2 = scmp.lt.s32.totalorder %s1497_s13, 5 }
  0x1a   : > { %1964 = sst [smem:[#allocation27_spill]] %s1489_s11  ;;  %s1500_s16 = smov [#allocation14]  }
  0x1b   : > { %1965 = sst [smem:[#allocation28_spill]] %s1493_s12  ;;  %p1620_p3 = pnand %p999_p0, %p230_p2 }
  0x1c   : > { %s242_s17 = sshll.u32 %s1500_s16, 4  ;;  %s243_s17 = int_to_ptr.vmem [resolvable:$true] %s242_s17 }
  0x1d   : > { %s1966_s15 = scalar_select %p1620_p3, 1, 0 }
  0x1e   : > { %p1069_p4 = pneg %p1620_p3  ;;  %s1242_s19 = scalar_lea.vmem %s243_s17, 256 }
  0x1f   : > { %p1243_p7 = scmp.ne.s32.totalorder %s243_s17, %s1242_s19  ;;  %p1250_p10 = scmp.lt.s32.totalorder %s243_s17, %s243_s17 }
  0x20   : > { %p1628_p5 = pnand %p1069_p4, %p1945_p1  ;;  %p1251_p11 = scmp.lt.s32.totalorder %s1242_s19, %s1242_s19 }
  0x22   : > { %p1233_p6 = pneg %p1628_p5  ;;  %p1252_p12 = por %p1251_p11, %p1250_p10 }
  0x24   : > { %p1245_p8 = pnand %p1243_p7, %p1233_p6 }
  0x26   : > { %p1246_p9 = pneg %p1245_p8 }
  0x28   : > { %p1253_p13 = pnand %p1252_p12, %p1246_p9 }
  0x2a   : > { %1256 = shalt.err (!%p1253_p13)
}
  0x2b   : > { %s1936_s20 = smov 128   ;;  %s1937_s21 = smov 8  }
  0x2c   : > { %s1968_s4 = sld [smem:[#allocation35_spill]]  ;;  %s43_s24 = sadd.s32 1, %s1489_s11 }
  0x2d   : > { %p44_p0 = scmp.ge.s32.totalorder %s43_s24, 2  ;;  %s50_s25 = sadd.s32 1, %s1493_s12 }
  0x2e   : > { %p1946_p2 = scmp.eq.s32.totalorder %s1497_s13, 0  ;;  %s87_s26 = sadd.s32 1, %s1465_s29 }
  0x2f   : > { %s2021_s24 = smov (%p44_p0, %s43_s24), 0  ;;  %s2023_s25 = smov (!%p44_p0, %s50_s25), %s1493_s12 }
  0x30   : > { %1969 = sst [smem:[#allocation29_spill]] %s2021_s24  ;;  %p94_p4 = scmp.ne.s32.totalorder %s1465_s29, %s1461_s28 }
  0x31   : > { %p52_p7 = scmp.ge.s32.totalorder %s2023_s25, 2  ;;  %p100_p8 = scmp.ne.s32.totalorder %s1461_s28, %s1457_s27 }
  0x32   : > { %1072 = dma.hbm_to_vmem [thread:$0]  (!%p1628_p5), %s1968_s4, 256, %s243_s17, [#allocation15], %s1936_s20, %s1936_s20, %s1937_s21  }
  0x33   : > { %s83_s16 = ssub.s32 %s1489_s11, %s2021_s24  ;;  %p1660_p9 = por %p94_p4, %p1946_p2 }
  0x34   : > { %s2025_s25 = smov (%p52_p7, %s2023_s25), 0  ;;  %p1668_p10 = por %p100_p8, %p1945_p1 }
  0x35   : > { %1971 = sst [smem:[#allocation30_spill]] %s2025_s25  ;;  %s291_s22 = sand.u32 1, %s1497_s13  }
  0x36   : > { %s1972_s19 = scalar_select %p1668_p10, 1, 0 }
  0x37   : > { %s1675_s23 = ssub.s32 %s1493_s12, %s2025_s25  ;;  %p1944_p11 = scmp.lt.s32.totalorder %s1497_s13, 4 }
  0x38   : > { %1973 = sst [smem:[#allocation31_spill]] %s1972_s19  ;;  %s84_s27 = sor.u32 %s83_s16, %s1675_s23 }
  0x39   : > { %p85_p12 = scmp.eq.s32.totalorder %s84_s27, 0  ;;  %s293_s20 = sand.u32 1, %s1465_s29  }
  0x3a   : > { %s1680_s21 = sshll.u32 %s293_s20, 3  ;;  %s1006_s4 = sshll.u32 %s1493_s12, 1 }
  0x3b   : > { %s1684_s24 = scalar_select %p85_p12, %s1465_s29, %s87_s26  }
  0x3c   : > { %s1687_s7 = sadd.s32 %s1489_s11, %s1006_s4  ;;  %s295_s10 = scalar_lea.vmem [#allocation11], %s1680_s21 }
  0x3d   : > { %1974 = sst [smem:[#allocation32_spill]] %s1684_s24  ;;  %s1950_s6 = sshll.u32 %s1687_s7, 7 }
  0x3e   : > { %s304_s25 = sshll.u32 %s295_s10, 4  ;;  %s1975_s2 = sld [smem:[#allocation34_spill]]  ;;  %s305_s25 = int_to_ptr.vmem [resolvable:$true] %s304_s25 }
  0x3f   : > { %p1701_p0 = pnand %p1944_p11, %p1660_p9  ;;  %s1503_s4 = smov [#allocation16]  }
  0x40   : > { %s255_s26 = sshll.u32 %s1503_s4, 4  ;;  %s1705_s27 = scalar_lea.sflag [#allocation12], %s291_s22  ;;  %s256_s26 = int_to_ptr.vmem [resolvable:$true] %s255_s26 }
  0x41   : > { %p1947_p4 = pneg %p1701_p0  ;;  %s1270_s10 = scalar_lea.vmem %s305_s25, 128 }
  0x42   : > { %p1271_p7 = scmp.ne.s32.totalorder %s305_s25, %s1270_s10  ;;  %s1504_s9 = smov [#allocation11]  }
  0x43   : > { %s1275_s17 = sshll.u32 %s1504_s9, 4  ;;  %s1276_s17 = int_to_ptr.vmem [resolvable:$false] %s1275_s17 }
  0x44   : > { %s302_s16 = scalar_lea.hbm %s1975_s2, %s1950_s6  ;;  %p1273_p8 = pnand %p1271_p7, %p1947_p4 }
  0x45   : > { %s1277_s19 = scalar_lea.vmem %s1276_s17, 256  ;;  %p1278_p9 = scmp.lt.s32.totalorder %s305_s25, %s1276_s17 }
  0x46   : > { %p1274_p12 = pneg %p1273_p8  ;;  %p1279_p11 = scmp.lt.s32.totalorder %s1277_s19, %s1270_s10 }
  0x48   : > { %p1280_p1 = por %p1279_p11, %p1278_p9 }
  0x4a   : > { %p1281_p2 = pnand %p1280_p1, %p1274_p12 }
  0x4c   : > { %1284 = shalt.err (!%p1281_p2)
}
  0x4d   : > { %1082 = dma.hbm_to_vmem [thread:$0]  (!%p1701_p0), %s302_s16, 128, %s305_s25, %s1705_s27  }
  0x4e   : > { %s1296_s22 = scalar_lea.vmem %s256_s26, 256  ;;  %p1304_p4 = scmp.lt.s32.totalorder %s256_s26, %s256_s26 }
  0x4f   : > { %p1297_p13 = scmp.ne.s32.totalorder %s256_s26, %s1296_s22  ;;  %p1305_p10 = scmp.lt.s32.totalorder %s1296_s22, %s1296_s22 }
  0x51   : > { %p1299_p7 = pnand %p1297_p13, %p1233_p6  ;;  %p1306_p3 = por %p1305_p10, %p1304_p4 }
  0x53   : > { %p1300_p8 = pneg %p1299_p7 }
  0x55   : > { %p1307_p9 = pnand %p1306_p3, %p1300_p8 }
  0x57   : > { %1310 = shalt.err (!%p1307_p9)
}
  0x58   : > { %s1977_s4 = smov 8   ;;  %s1978_s10 = smov 128  }
  0x59   : > { %s1979_s5 = sld [smem:[#allocation36_spill]]  ;;  %s998_s18 = sadd.s32 4294967294, %s1497_s13  }
  0x5a   : > { %s59_s25 = sadd.s32 1, %s1477_s0  ;;  %p66_p1 = scmp.ne.s32.totalorder %s1477_s0, %s1473_s8 }
  0x5b   : > { %p1980_p3 = scmp.eq.s32.totalorder %s1675_s23, 0  ;;  %p1982_p6 = scmp.eq.s32.totalorder %s1497_s13, 0 }
  0x5c   : > { %p72_p10 = scmp.ne.s32.totalorder %s1473_s8, %s1469_s30  ;;  %p217_p11 = scmp.eq.s32.totalorder %s1615_s14, 3 }
  0x5d   : > { %s1733_s16 = scalar_select %p1980_p3, %s1477_s0, %s59_s25  }
  0x5e   : > { %p1737_p2 = por %p1982_p6, %p66_p1  ;;  %p223_p13 = scmp.eq.s32.totalorder %s998_s18, 3 }
  0x5f   : > { %1075 = dma.hbm_to_vmem [thread:$0]  (!%p1628_p5), %s1979_s5, 256, %s256_s26, [#allocation15], %s1978_s10, %s1978_s10, %s1977_s4  }
  0x60   : > { %1981 = sst [smem:[#allocation33_spill]] %s1733_s16  ;;  %p1984_p4 = scmp.eq.s32.totalorder %s1615_s14, 0 }
  0x61   : > { %s272_s23 = sand.u32 1, %s1477_s0   ;;  %p1751_p12 = por %p217_p11, %p66_p1 }
  0x62   : > { %p1746_p5 = por %p1984_p4, %p72_p10  ;;  %p1755_p7 = por %p223_p13, %p72_p10 }
  0x63   : > { %s1003_s10 = sshll.u32 %s272_s23, 3  ;;  %s1004_s9 = sshll.u32 %s1493_s12, 7 }
  0x64   : > { %s282_s18 = scalar_lea.hbm %s1929_s1, %s1004_s9  ;;  %s276_s6 = scalar_lea.vmem [#allocation8], %s1003_s10 }
  0x65   : > { %s284_s2 = sshll.u32 %s276_s6, 4  ;;  %p1988_p8 = scmp.lt.s32.totalorder %s1497_s13, 4  ;;  %s285_s2 = int_to_ptr.vmem [resolvable:$true] %s284_s2 }
  0x66   : > { %s1990_s11 = sshll.u32 %s1687_s7, 7  ;;  %s315_s12 = scalar_lea.vmem [#allocation13], %s1680_s21 }
  0x67   : > { %p1767_p9 = pnand %p1988_p8, %p1737_p2  ;;  %s1776_s24 = scalar_lea.hbm %s1931_s3, %s1990_s11 }
  0x68   : > { %s324_s29 = sshll.u32 %s315_s12, 4  ;;  %s273_s10 = scalar_lea.sflag [#allocation9], %s272_s23  ;;  %s1779_s29 = int_to_ptr.vmem [resolvable:$true] %s324_s29 }
  0x69   : > { %p1313_p1 = pneg %p1767_p9  ;;  %s1324_s6 = scalar_lea.vmem %s285_s2, 128 }
  0x6a   : > { %p1325_p3 = scmp.ne.s32.totalorder %s285_s2, %s1324_s6  ;;  %s1505_s19 = smov [#allocation8]  }
  0x6b   : > { %s1329_s9 = sshll.u32 %s1505_s19, 4  ;;  %s1330_s9 = int_to_ptr.vmem [resolvable:$false] %s1329_s9 }
  0x6c   : > { %p1327_p6 = pnand %p1325_p3, %p1313_p1  ;;  %s1331_s7 = scalar_lea.vmem %s1330_s9, 256 }
  0x6d   : > { %p1332_p10 = scmp.lt.s32.totalorder %s285_s2, %s1330_s9  ;;  %p1333_p11 = scmp.lt.s32.totalorder %s1331_s7, %s1324_s6 }
  0x6e   : > { %p1328_p2 = pneg %p1327_p6 }
  0x6f   : > { %p1334_p13 = por %p1333_p11, %p1332_p10 }
  0x71   : > { %p1335_p4 = pnand %p1334_p13, %p1328_p2 }
  0x73   : > { %1338 = shalt.err (!%p1335_p4)
}
  0x74   : > { %1079 = dma.hbm_to_vmem [thread:$0]  (!%p1767_p9), %s282_s18, 128, %s285_s2, %s273_s10  }
  0x75   : > { %s1352_s0 = scalar_lea.vmem %s1779_s29, 128  ;;  %p1991_p1 = pneg %p1701_p0 }
  0x76   : > { %p1353_p8 = scmp.ne.s32.totalorder %s1779_s29, %s1352_s0  ;;  %s1506_s11 = smov [#allocation13]  }
  0x77   : > { %s1357_s12 = sshll.u32 %s1506_s11, 4  ;;  %s1358_s12 = int_to_ptr.vmem [resolvable:$false] %s1357_s12 }
  0x78   : > { %p1355_p3 = pnand %p1353_p8, %p1991_p1  ;;  %s1359_s21 = scalar_lea.vmem %s1358_s12, 256 }
  0x79   : > { %p1360_p10 = scmp.lt.s32.totalorder %s1779_s29, %s1358_s12  ;;  %p1361_p2 = scmp.lt.s32.totalorder %s1359_s21, %s1352_s0 }
  0x7a   : > { %p1356_p6 = pneg %p1355_p3 }
  0x7b   : > { %p1362_p11 = por %p1361_p2, %p1360_p10 }
  0x7d   : > { %p1363_p13 = pnand %p1362_p11, %p1356_p6 }
  0x7f   : > { %1366 = shalt.err (!%p1363_p13)
}
  0x80   : > { %1085 = dma.hbm_to_vmem [thread:$0]  (!%p1701_p0), %s1776_s24, 128, %s1779_s29, %s1705_s27  }
  0x81   : > { %p1992_p9 = scmp.ne.s32.totalorder %s1966_s15, 0 }
  0x82   : > { %s1799_s2 = sand.u32 (!%p1992_p9), 1, %s1473_s8  }
  0x83   : > { %333 = sbr.rel (%p1992_p9) target bundleno = 1407 (0x57f), region = 44  ;;  %s1012_s5 = sshll.u32 (!%p1992_p9), %s1799_s2, 3 }
  0x84   : > { %s336_s16 = scalar_lea.sflag (!%p1992_p9), [#allocation9], %s1799_s2  ;;  %s339_s23 = scalar_lea.vmem (!%p1992_p9), [#allocation8], %s1012_s5 }
  0x88   : > { %1440 = dma.done.wait (%p1746_p5), %s336_s16, 128  }
  0x89   : > { %1442 = vsyncadd (%p1746_p5), %s336_s16, 4294967168  ;;  %s1993_s29 = sld [smem:[#allocation31_spill]]  ;;  %s344_s24 = sand.u32 1, %s1615_s14  }
  0x8a   : > { %s346_s15 = sand.u32 1, %s1461_s28   ;;  %s345_s27 = scalar_lea.sflag [#allocation12], %s344_s24 }
  0x8b   : > { %s1809_s20 = sshll.u32 %s346_s15, 3 }
  0x8c   : > { %s348_s17 = scalar_lea.vmem [#allocation11], %s1809_s20 }
  0x8f   : > { %p1994_p0 = scmp.ne.s32.totalorder %s1993_s29, 0 }
  0x91   : > { %1444 = dma.done.wait (%p1994_p0), %s345_s27, 256  }
  0x92   : > { %1446 = vsyncadd (%p1994_p0), %s345_s27, 4294967040  ;;  %s357_s25 = scalar_lea.vmem [#allocation13], %s1809_s20  ;;  %p1995_p4 = scmp.eq.s32.totalorder %s1615_s14, 0 }
  0x94   : > { %1448 = dma.done.wait (%p1995_p4), [#allocation15], 512   ;;  %p1996_p5 = pmov %p1995_p4 }
  0x95   : > { %s1997_s26 = sld [smem:[#allocation25_spill]]  ;;  %s1825_s19 = scalar_lea.vmem [#allocation17], %s1012_s5 }
  0x96   : > { %1450 = vsyncadd (%p1996_p5), [#allocation15], 4294966784  ;;  %s1998_s18 = sld [smem:[#allocation26_spill]] }
  0x9b   : > { %s1018_s10 = sshll.u32 %s1997_s26, 3  ;;  %p1019_p8 = scmp.ne.s32.totalorder %s1997_s26, 0 }
  0x9c   : > { %s1823_s6 = sld [smem:[#allocation7 + %s1998_s18]] }
  0x9d   : > { %410 = sbr.rel (%p1019_p8) target bundleno = 367 (0x16f), region = 68 }
  0xa2   : > { %vm411_vm0 = vcmask 7168   ;;  %v418_v0 = vld [vmem:[#allocation14] sm:$0xff]  ;;  %v419_v1 = vld [vmem:[#allocation14 + $0x8] sm:$0xff]  ;;  %v1507_v2 = vmov -inf   ;;  %v1508_v3 = vmov 0.0   ;;  %vm1509_vm1 = vmmov 0  }
  0xa3   : > { %412 = vst.msk [vmem:[#allocation2] sm:$0xff] %vm411_vm0, %v1507_v2  ;;  %413 = vst.msk [vmem:[#allocation3] sm:$0xff] %vm411_vm0, %v1508_v3  ;;  %1035 = vmatprep.subr.bf16.mxu0 %v1508_v3  ;;  %v420_v4 = vpack.c.bf16 %v419_v1, %v418_v0  ;;  %1037 = vmatprep.mubr.msk.bf16.mxu0 %vm1509_vm1, %v1508_v3  ;;  %vm414_vm2 = vcmask 130048   ;;  %v416_v5 = vld [vmem:[%s339_s23] sm:$0xff]  ;;  %vm464_vm3 = vcmask 261120  }
  0xa4   : > { %415 = vst.msk [vmem:[#allocation4] sm:$0xff] %vm414_vm2, %v1508_v3  ;;  %v417_v6 = vpack.c.bf16 %v416_v5, %v416_v5 }
  0xa5   : > { %1036 = vmatpush3.bf16.msra.mxu0 %v420_v4 }
  0xa8   : > { %1038 = vmatmul.mubr.msk.bf16.vlgmr.msra.gmra.mxu0 %vm414_vm2, %v417_v6 }
 0x168   : > { %v458_v7 = vpop.f32.mrf.mxu0 }
 0x169   : > { %465 = vst.msk [vmem:[#allocation5] sm:$0xff] %vm464_vm3, %v458_v7 }
 0x16a   : > { %v1039_v8 = vpop.f32.mrf.mxu0 }
 0x16c   : > { %v461_v9 = vpop.f32.mrf.mxu0 }
 0x16e   : > { %v1040_v10 = vpop.f32.mrf.mxu0 }
 0x16f PF: > { %p466_p1 = scmp.eq.s32.totalorder %s1823_s6, 0  ;;  %p467_p3 = scmp.lt.s32.totalorder %s1018_s10, %s1823_s6 }
 0x171   : > { %p468_p6 = por %p467_p3, %p466_p1 }
 0x172   : > { %v474_v11 = vld [vmem:[#allocation16] sm:$0xff] (%p468_p6)  ;;  %v475_v12 = vld [vmem:[#allocation16 + $0x8] sm:$0xff] (%p468_p6)  ;;  %v472_v13 = vld [vmem:[%s348_s17] sm:$0xff] (%p468_p6)  ;;  %v1510_v14 = vmov (%p468_p6), 0.0   ;;  %vm1511_vm4 = vmmov (%p468_p6), 0   ;;  %vm477_vm5 = vcmask (%p468_p6), 130048   ;;  %v527_v17 = vlaneseq (%p468_p6) }
 0x173   : > { %471 = sbr.rel (!%p468_p6) target bundleno = 1228 (0x4cc), region = 72  ;;  %1041 = vmatprep.subr.bf16.mxu0 (%p468_p6), %v1510_v14  ;;  %v476_v15 = vpack.c.bf16 (%p468_p6), %v475_v12, %v474_v11  ;;  %1043 = vmatprep.mubr.msk.bf16.mxu0 (%p468_p6), %vm1511_vm4, %v1510_v14  ;;  %v473_v16 = vpack.c.bf16 (%p468_p6), %v472_v13, %v472_v13  ;;  %v1512_v21 = vmov (%p468_p6), 1966171168   ;;  %v521_v25 = vld [vmem:[#allocation5] sm:$0xff] (%p468_p6)  ;;  %s2000_s0 = sld [smem:[#allocation37_spill]] (%p468_p6)  ;;  %vm643_vm6 = vcmask (%p468_p6), 261120  }
 0x174   : > { %1047 = vmatprep.subr.bf16.mxu1 (%p468_p6), %v1510_v14  ;;  %1049 = vmatprep.mubr.msk.bf16.mxu1 (%p468_p6), %vm1511_vm4, %v1510_v14  ;;  %v528_v18 = vshrl.u32 (%p468_p6), %v527_v17, 7  ;;  %v1835_v19 = vand.u32 (%p468_p6), 127, %v527_v17  ;;  %v525_v22 = vunpack.c.l.s4 (%p468_p6), %v1512_v21  ;;  %v523_v27 = vcombine.high (%p468_p6), %v521_v25, %v521_v25 }
 0x175   : > { %1042 = vmatpush3.bf16.msra.mxu0 (%p468_p6), %v476_v15  ;;  %vm714_vm7 = vcmask (%p468_p6), 1041409   ;;  %vm716_vm8 = vcmask (%p468_p6), 1042434   ;;  %vm718_vm9 = vcmask (%p468_p6), 1043459   ;;  %vm720_vm10 = vcmask (%p468_p6), 1044484  }
 0x176   : > { %v1838_v20 = vsub.s32 (%p468_p6), %v1835_v19, %v528_v18  ;;  %v526_v23 = vunpack.c.0.s8 (%p468_p6), %v525_v22  ;;  %v574_v34 = vsub.s32 (%p468_p6), 0, %v528_v18  ;;  %vm722_vm11 = vcmask (%p468_p6), 1045509  }
 0x177   : > { %vm724_vm12 = vcmask (%p468_p6), 1046534   ;;  %vm726_vm13 = vcmask (%p468_p6), 1047559   ;;  %vm731_vm15 = vcmask (%p468_p6), 64512   ;;  %vm753_vm0 = vcmask (%p468_p6), 7168  }
 0x178   : > { %1044 = vmatmul.mubr.msk.bf16.vlgmr.msra.gmra.mxu0 %vm477_vm5, %v473_v16  ;;  %v529_v24 = vsub.s32 %v526_v23, %v528_v18  ;;  %vm768_vm1 = vcmask 1043456  }
 0x179   : > { %v1022_v60 = vld [vmem:[%s2000_s0] ss:$0 sm:$0xff] }
 0x17a   : > { %v530_v26 = vrot.slane %v521_v25, %v529_v24  ;;  %v537_v29 = vrot.slane %v523_v27, %v529_v24 }
 0x17c   : > { %v538_v28 = vcombine.high %v530_v26, %v530_v26  ;;  %v546_v30 = vrot.slane %v530_v26, %v529_v24  ;;  %v539_v32 = vcombine.high %v537_v29, %v537_v29  ;;  %v553_v37 = vrot.slane %v537_v29, %v529_v24 }
 0x17e   : > { %v560_v31 = vrot.slane %v538_v28, %v529_v24  ;;  %v568_v33 = vcombine.high %v546_v30, %v546_v30  ;;  %v567_v36 = vrot.slane %v539_v32, %v529_v24  ;;  %v575_v39 = vrot.slane %v546_v30, %v574_v34 }
 0x17f   : > { %v591_v45 = vrot.slane %v553_v37, %v574_v34  ;;  %v569_v46 = vcombine.high %v553_v37, %v553_v37 }
 0x180   : > { %v570_v35 = vcombine.high %v560_v31, %v560_v31  ;;  %v583_v38 = vrot.slane %v568_v33, %v574_v34  ;;  %v579_v41 = vrot.slane %v560_v31, %v574_v34  ;;  %v595_v42 = vrot.slane %v567_v36, %v574_v34 }
 0x181   : > { %v571_v43 = vcombine.high %v567_v36, %v567_v36  ;;  %v599_v56 = vrot.slane %v569_v46, %v574_v34  ;;  %v670_v33 = vstv %s1018_s10 }
 0x182   : > { %v587_v40 = vrot.slane %v570_v35, %v574_v34 }
 0x183   : > { %v603_v53 = vrot.slane %v571_v43, %v574_v34 }
 0x238   : > { %v515_v44 = vpop.f32.mrf.mxu0 }
 0x239   : > { %v614_v47 = vadd.f32 %v583_v38, %v515_v44  ;;  %v612_v48 = vadd.f32 %v575_v39, %v515_v44  ;;  %v615_v49 = vadd.f32 %v587_v40, %v515_v44  ;;  %v613_v51 = vadd.f32 %v579_v41, %v515_v44 }
 0x23a   : > { %v1045_v50 = vpop.f32.mrf.mxu0  ;;  %v617_v52 = vadd.f32 %v595_v42, %v515_v44  ;;  %v616_v55 = vadd.f32 %v591_v45, %v515_v44  ;;  %v619_v58 = vadd.f32 %v603_v53, %v515_v44  ;;  %v618_v59 = vadd.f32 %v599_v56, %v515_v44 }
 0x23b   : > { %1200 = vtanh.f32 %v614_v47  ;;  %v671_v39 = vadd.s32 %v670_v33, %v1835_v19  ;;  %v672_v42 = vstv %s1823_s6  ;;  %v1513_v50 = vmov 0  }
 0x23c   : > { %v518_v54 = vpop.f32.mrf.mxu0  ;;  %1202 = vtanh.f32 %v612_v48  ;;  %1197 = vset.pattern.permute.xlu1 %v1513_v50  ;;  %1198 = vset.pattern.permute.xlu0 %v1513_v50 }
 0x23d   : > { %1204 = vtanh.f32 %v615_v49  ;;  %vm673_vm14 = vcmp.lt.s32.totalorder %v671_v39, %v672_v42 }
 0x23e   : > { %v1046_v57 = vpop.f32.mrf.mxu0  ;;  %1206 = vtanh.f32 %v613_v51  ;;  %v730_v51 = vld [vmem:[#allocation2] sm:$0xff] }
 0x23f   : > { %1208 = vtanh.f32 %v617_v52 }
 0x240   : > { %1210 = vtanh.f32 %v616_v55 }
 0x241   : > { %1212 = vtanh.f32 %v619_v58 }
 0x242   : > { %1214 = vtanh.f32 %v618_v59 }
 0x248   : > { %v1201_v61 = vpop.eup %1200 }
 0x249   : > { %v1203_v62 = vpop.eup %1202  ;;  %v637_v63 = vmul.f32 %v1201_v61, %v1022_v60 }
 0x24a   : > { %v1205_v0 = vpop.eup %1204  ;;  %v635_v1 = vmul.f32 %v1203_v62, %v1022_v60 }
 0x24b   : > { %v1207_v2 = vpop.eup %1206  ;;  %v650_v3 = vsel %vm643_vm6, %v637_v63, 0.0  ;;  %v638_v4 = vmul.f32 %v1205_v0, %v1022_v60 }
 0x24c   : > { %v1209_v5 = vpop.eup %1208  ;;  %651 = vadd.xlane.f32.xlu1 %v650_v3  ;;  %v644_v6 = vsel %vm643_vm6, %v635_v1, 0.0  ;;  %v636_v7 = vmul.f32 %v1207_v2, %v1022_v60  ;;  %v747_v1 = vld [vmem:[#allocation3] sm:$0xff] }
 0x24d   : > { %v1211_v8 = vpop.eup %1210  ;;  %645 = vadd.xlane.f32.xlu0 %v644_v6  ;;  %v653_v9 = vsel %vm643_vm6, %v638_v4, 0.0  ;;  %v640_v10 = vmul.f32 %v1209_v5, %v1022_v60  ;;  %v755_v5 = vld [vmem:[#allocation4] sm:$0xff] }
 0x24e   : > { %v1213_v11 = vpop.eup %1212  ;;  %v647_v12 = vsel %vm643_vm6, %v636_v7, 0.0  ;;  %v639_v13 = vmul.f32 %v1211_v8, %v1022_v60 }
 0x24f   : > { %v1215_v14 = vpop.eup %1214  ;;  %v659_v15 = vsel %vm643_vm6, %v640_v10, 0.0  ;;  %v642_v16 = vmul.f32 %v1213_v11, %v1022_v60 }
 0x250   : > { %654 = vadd.xlane.f32.xlu1 %v653_v9  ;;  %v656_v17 = vsel %vm643_vm6, %v639_v13, 0.0  ;;  %v641_v18 = vmul.f32 %v1215_v14, %v1022_v60 }
 0x251   : > { %648 = vadd.xlane.f32.xlu0 %v647_v12  ;;  %v665_v21 = vsel %vm643_vm6, %v642_v16, 0.0 }
 0x252   : > { %v662_v22 = vsel %vm643_vm6, %v641_v18, 0.0 }
 0x254   : > { %660 = vadd.xlane.f32.xlu1 %v659_v15 }
 0x255   : > { %657 = vadd.xlane.f32.xlu0 %v656_v17 }
 0x258   : > { %666 = vadd.xlane.f32.xlu1 %v665_v21 }
 0x259   : > { %663 = vadd.xlane.f32.xlu0 %v662_v22 }
 0x2d5   : > { %v652_v23 = vpop.xlane.xlu1 %651 }
 0x2d6   : > { %v646_v24 = vpop.xlane.xlu0 %645  ;;  %v693_v29 = vrot.slane %v652_v23, %v1838_v20 }
 0x2d7   : > { %v685_v27 = vrot.slane %v646_v24, %v1838_v20 }
 0x2d9   : > { %v655_v25 = vpop.xlane.xlu1 %654 }
 0x2da   : > { %v649_v26 = vpop.xlane.xlu0 %648  ;;  %v697_v30 = vrot.slane %v655_v25, %v1838_v20 }
 0x2db   : > { %v689_v28 = vrot.slane %v649_v26, %v1838_v20 }
 0x2dd   : > { %v715_v31 = vsel %vm714_vm7, %v689_v28, %v685_v27  ;;  %v661_v32 = vpop.xlane.xlu1 %660 }
 0x2de   : > { %v717_v34 = vsel %vm716_vm8, %v693_v29, %v715_v31  ;;  %v658_v35 = vpop.xlane.xlu0 %657  ;;  %v705_v38 = vrot.slane %v661_v32, %v1838_v20 }
 0x2df   : > { %v719_v36 = vsel %vm718_vm9, %v697_v30, %v717_v34  ;;  %v701_v37 = vrot.slane %v658_v35, %v1838_v20 }
 0x2e1   : > { %v721_v40 = vsel %vm720_vm10, %v701_v37, %v719_v36  ;;  %v667_v41 = vpop.xlane.xlu1 %666 }
 0x2e2   : > { %v713_v43 = vrot.slane %v667_v41, %v1838_v20  ;;  %v664_v44 = vpop.xlane.xlu0 %663  ;;  %v723_v46 = vsel %vm722_vm11, %v705_v38, %v721_v40 }
 0x2e3   : > { %v709_v45 = vrot.slane %v664_v44, %v1838_v20  ;;  %v763_v20 = vld [vmem:[%s357_s25] sm:$0xff] }
 0x2e4   : > { %v764_v55 = vpack.c.bf16 %v763_v20, %v763_v20 }
 0x2e5   : > { %v725_v47 = vsel %vm724_vm12, %v709_v45, %v723_v46 }
 0x2e6   : > { %v727_v48 = vsel %vm726_vm13, %v713_v43, %v725_v47  ;;  %v770_v56 = vsel %vm768_vm1, %v764_v55, 0 }
 0x2e7   : > { %v729_v49 = vsel %vm673_vm14, %v727_v48, -1000000.0  ;;  %1048 = vmatpush3.bf16.msra.mxu1 %v770_v56 }
 0x2e8   : > { %v732_v19 = vsel %vm731_vm15, %v729_v49, -inf }
 0x2e9   : > { %733 = vmax.xlane.f32.xlu0 %v732_v19 }
 0x372   : > { %v734_v52 = vpop.xlane.xlu0 %733 }
 0x373   : > { %v735_v53 = vmax.f32 %v730_v51, %v734_v52 }
 0x375   : > { %v736_v54 = vsub.f32 %v730_v51, %v735_v53  ;;  %814 = vst.msk [vmem:[#allocation2] sm:$0xff] %vm753_vm0, %v735_v53  ;;  %741 = vperm.xlu1 %1197, %v735_v53  }
 0x377   : > { %v737_v63 = vmul.f32 1.442695, %v736_v54 }
 0x3f0   : > { %v742_v57 = vpop.permute.xlu1 %741 }
 0x3f1   : > { %v744_v58 = vsub.f32 %v729_v49, %v742_v57 }
 0x3f3   : > { %v745_v59 = vmul.f32 1.442695, %v744_v58 }
 0x3f5   : > { %1216 = vpow2.f32 %v745_v59 }
 0x3f6   : > { %1218 = vpow2.f32 %v737_v63 }
 0x402   : > { %v1217_v60 = vpop.eup %1216 }
 0x403   : > { %v749_v61 = vsel %vm731_vm15, %v1217_v60, 0.0  ;;  %v762_v62 = vpack.c.bf16 %v1217_v60, %v1217_v60  ;;  %v1219_v0 = vpop.eup %1218 }
 0x404   : > { %750 = vadd.xlane.f32.xlu0 %v749_v61  ;;  %v748_v2 = vmul.f32 %v1219_v0, %v747_v1 }
 0x405   : > { %1050 = vmatmul.mubr.msk.bf16.vlgmr.msra.gmra.mxu1 %vm731_vm15, %v762_v62 }
 0x41a   : > { %758 = vperm.xlu0 %1198, %v1219_v0  }
 0x48d   : > { %v751_v3 = vpop.xlane.xlu0 %750 }
 0x48e   : > { %v752_v4 = vadd.f32 %v751_v3, %v748_v2 }
 0x490   : > { %754 = vst.msk [vmem:[#allocation3] sm:$0xff] %vm753_vm0, %v752_v4 }
 0x495   : > { %v759_v6 = vpop.permute.xlu0 %758 }
 0x496   : > { %v761_v7 = vmul.f32 %v759_v6, %v755_v5 }
 0x4c5   : > { %v806_v8 = vpop.f32.mrf.mxu1 }
 0x4c6   : > { %v812_v9 = vadd.f32 %v806_v8, %v761_v7 }
 0x4c7   : > { %v1051_v10 = vpop.f32.mrf.mxu1 }
 0x4c8   : > { %813 = vst.msk [vmem:[#allocation4] sm:$0xff] %vm477_vm5, %v812_v9 }
 0x4c9   : > { %v809_v11 = vpop.f32.mrf.mxu1 }
 0x4cb   : > { %v1052_v12 = vpop.f32.mrf.mxu1 }
 0x4cc PF: > { %s2002_s12 = sld [smem:[#allocation25_spill]] }
 0x4d2   : > { %p1024_p10 = scmp.ne.s32.totalorder %s2002_s12, 1 }
 0x4d4   : > { %818 = sbr.rel (%p1024_p10) target bundleno = 1383 (0x567), region = 76 }
 0x4d9   : > { %v820_v13 = vld [vmem:[#allocation3] sm:$0xff]  ;;  %v1514_v14 = vmov 0   ;;  %v819_v16 = vld [vmem:[#allocation4] sm:$0xff]  ;;  %vm828_vm2 = vcmask 130048  }
 0x4da   : > { %1220 = vset.pattern.permute.xlu0 %v1514_v14  ;;  %1221 = vrcp.f32 %v820_v13 }
 0x4e7   : > { %v1222_v15 = vpop.eup %1221 }
 0x4e8   : > { %824 = vperm.xlu0 %1220, %v1222_v15  }
 0x563   : > { %v825_v17 = vpop.permute.xlu0 %824 }
 0x564   : > { %v827_v18 = vmul.f32 %v825_v17, %v819_v16 }
 0x566   : > { %829 = vst.msk [vmem:[%s1825_s19] sm:$0xff] %vm828_vm2, %v827_v18 }
 0x567 PF: > { %s2003_s21 = sld [smem:[#allocation26_spill]]  ;;  %s845_s20 = sshll.u32 %s1825_s19, 4  ;;  %s846_s20 = int_to_ptr.vmem [resolvable:$true] %s845_s20 }
 0x568   : > { %s2004_s29 = sld [smem:[#allocation38_spill]]  ;;  %s831_s27 = scalar_lea.sflag [#allocation10], %s1799_s2 }
 0x569   : > { %s1367_s17 = scalar_lea.vmem %s846_s20, 128  ;;  %s1515_s25 = smov [#allocation17]  }
 0x56a   : > { %p1368_p2 = scmp.ne.s32.totalorder %s846_s20, %s1367_s17  ;;  %s1371_s26 = sshll.u32 %s1515_s25, 4  ;;  %s1372_s26 = int_to_ptr.vmem [resolvable:$false] %s1371_s26 }
 0x56b   : > { %s1373_s18 = scalar_lea.vmem %s1372_s26, 256  ;;  %p1374_p9 = scmp.lt.s32.totalorder %s846_s20, %s1372_s26 }
 0x56c   : > { %p1369_p11 = pnand %p1368_p2, %p1751_p12  ;;  %p1375_p0 = scmp.lt.s32.totalorder %s1373_s18, %s1367_s17 }
 0x56d   : > { %s1026_s5 = sshll.u32 %s2003_s21, 7 }
 0x56e   : > { %s2005_s24 = smov %s2004_s29  ;;  %s843_s15 = scalar_lea.hbm %s2004_s29, %s1026_s5 }
 0x56f   : > { %p1370_p13 = pneg %p1369_p11  ;;  %p1376_p4 = por %p1375_p0, %p1374_p9 }
 0x571   : > { %p1377_p5 = pnand %p1376_p4, %p1370_p13 }
 0x573   : > { %1380 = shalt.err (!%p1377_p5)
}
 0x574   : > { %s1381_s10 = scalar_lea.hbm %s843_s15, 128  ;;  %s1385_s19 = scalar_lea.hbm %s2005_s24, 256 }
 0x575   : > { %p1382_p8 = scmp.ne.s32.totalorder %s843_s15, %s1381_s10  ;;  %p1386_p6 = scmp.lt.s32.totalorder %s843_s15, %s2005_s24 }
 0x576   : > { %p1387_p10 = scmp.lt.s32.totalorder %s1385_s19, %s1381_s10 }
 0x577   : > { %p1383_p1 = pnand %p1382_p8, %p1751_p12 }
 0x578   : > { %p1388_p2 = por %p1387_p10, %p1386_p6 }
 0x579   : > { %p1384_p3 = pneg %p1383_p1 }
 0x57b   : > { %p1389_p11 = pnand %p1388_p2, %p1384_p3 }
 0x57d   : > { %1392 = shalt.err (!%p1389_p11)
}
 0x57e   : > { %1067 = dma.vmem_to_hbm [thread:$0]  (%p1751_p12), %s846_s20, 128, %s843_s15, %s831_s27  }
 0x57f PF: > { %p1095_p13 = scmp.ge.s32.totalorder %s1497_s13, 2  ;;  %s857_s7 = sand.u32 1, %s1469_s30  }
 0x580   : > { %s858_s0 = scalar_lea.sflag [#allocation10], %s857_s7 }
 0x581   : > { %p1087_p9 = pnand %p1095_p13, %p1755_p7 }
 0x583   : > { %p1088_p0 = pneg %p1087_p9 }
 0x585   : > { %1452 = dma.done.wait (%p1088_p0), %s858_s0, 128  }
 0x586   : > { %1454 = vsyncadd (%p1088_p0), %s858_s0, 4294967168  ;;  %s31_s13 = sadd.s32 1, %s1497_s13   ;;  %s2006_s11 = sld [smem:[#allocation23_spill]] }
 0x587   : > { %p28_p4 = scmp.ge.s32.totalorder %s31_s13, 6   ;;  %s2007_s29 = sld [smem:[#allocation32_spill]] }
 0x588   : > { %s2008_s22 = sld [smem:[#allocation24_spill]]  ;;  %s2014_s27 = smov %s1461_s28 }
 0x589   : > { %s2009_s0 = sld [smem:[#allocation33_spill]]  ;;  %s2016_s30 = smov %s1473_s8 }
 0x58a   : > { %s2010_s9 = sld [smem:[#allocation27_spill]] }
 0x58b   : > { %s2011_s10 = sld [smem:[#allocation28_spill]] }
 0x58c   : > { %s2012_s12 = sld [smem:[#allocation29_spill]]  ;;  %s2015_s28 = smov %s2006_s11 }
 0x58d   : > { %s2013_s21 = sld [smem:[#allocation30_spill]] }
 0x58e   : > { %s2017_s8 = smov %s2008_s22 }
 0x58f   :  { %30 = sbr.rel (!%p28_p4) target bundleno = 22 (0x16), region = 133 }
 0x592   : > { %s2018_s11 = smov %s2012_s12 }
 0x593   : > { %s2019_s12 = smov %s2013_s21 }
 0x594   :  { %863 = vsyncpa [#allocation9], 1 }
 0x595   :  { %865 = vsyncpa [#allocation9 + $0x1], 1 }
 0x596   :  { %866 = vsyncpa [#allocation12], 1 }
 0x597   :  { %868 = vsyncpa [#allocation12 + $0x1], 1 }
 0x598   :  { %869 = vsyncpa [#allocation15], 1 }
 0x599   :  { %870 = vsyncpa [#allocation10], 1 }
 0x59a   :  { %872 = vsyncpa [#allocation10 + $0x1], 1 }

</bundles_post_ra>
